<compile_context>
chip_gen: v7x
topology: tpu7x:2x2x1
jax: 0.10.0
libtpu: 0.0.40
codegen_flags: <defaults>
</compile_context>

<pallas_src>
import jax
import jax.numpy as jnp
from jax.experimental import pallas as pl
from jax.experimental.pallas import tpu as pltpu


def _make_kernel(num_classes: int, epsilon: float, batch: int, block_b: int):
    smooth_off = epsilon / num_classes      # eps / K
    smooth_on = 1.0 - epsilon               # 1 - eps

    def kernel(x_ref, t_ref, o_ref):
        # x_ref: (TB, C) logits in native dtype; t_ref: (TB, 1) int32 labels.
        x = x_ref[...]
        t = t_ref[...]

        # log-sum-exp in f32 (v5e has no bf16 VPU/EUP; accumulation needs f32).
        xf = x.astype(jnp.float32)
        m = jnp.max(xf, axis=1, keepdims=True)                           # (TB,1)
        shifted = xf - m                                                 # (TB,C)
        sum_exp = jnp.sum(jnp.exp(shifted), axis=1, keepdims=True)       # (TB,1)
        lse = m + jnp.log(sum_exp)                                       # true LSE

        # Label gather in the NATIVE dtype vregs (exact: only one element per
        # row survives the select); cast only the (TB, 1) result to f32.
        class_ids = jax.lax.broadcasted_iota(jnp.int32, x.shape, 1)
        x_t = jnp.sum(jnp.where(class_ids == t, x, jnp.zeros_like(x)),
                      axis=1, keepdims=True).astype(jnp.float32)         # (TB,1)

        # eps/K * sum_c x must accumulate in f32 (many small terms).
        row_sum = jnp.sum(xf, axis=1, keepdims=True)                     # (TB,1)

        # loss_r = lse_r - (1-eps)*x_t - (eps/K)*sum_c x
        row_loss = lse - smooth_on * x_t - smooth_off * row_sum          # (TB,1)

        # Mask rows past the true batch (partial final block reads garbage).
        row_ids = (pl.program_id(0) * block_b
                   + jax.lax.broadcasted_iota(jnp.int32, row_loss.shape, 0))
        row_loss = jnp.where(row_ids < batch, row_loss, 0.0)

        # Lane-dense partial-sum output block for this grid step (unmasked vst).
        o_ref[...] = jnp.full(o_ref.shape, jnp.sum(row_loss), dtype=o_ref.dtype)

    return kernel


def _sublane_multiple(itemsize: int) -> int:
    # f32 -> 8, bf16/f16 -> 16, int8/fp8 -> 32 (sub-32-bit packs along sublanes).
    return max(8, 32 // max(1, itemsize))


def _pick_block_b(batch: int, num_classes: int, itemsize: int) -> int:
    sub = _sublane_multiple(itemsize)
    # Per-row VMEM bytes: 2x double-buffered native logits tile + ~4 f32 (TB,C)
    # body temporaries (xf, shifted, exp, select result) + labels.
    per_row = num_classes * (2 * itemsize + 4 * 4) + 2 * 4
    budget = 32 * 1024 * 1024   # headroom inside the 48 MiB vmem_limit on all gens
    tb = budget // max(1, per_row)
    tb = max(sub, min(1024, (tb // sub) * sub))

    padded_b = ((batch + sub - 1) // sub) * sub
    tb = min(tb, padded_b)

    # Ensure >= 2 grid blocks when the batch allows it, so the "parallel" batch
    # axis can shard across v7x's two TensorCores (harmless on v5e/v6e).
    if padded_b >= 2 * sub:
        half = ((-(-padded_b // 2)) + sub - 1) // sub * sub
        tb = min(tb, half)
    return tb


def cross_entropy_label_smooth(inputs, targets, num_classes, epsilon=0.1,
                               block_b=None):
    """inputs: (B, C) logits (any float dtype); targets: (B,) int labels -> scalar f32."""
    B, C = inputs.shape
    assert C == num_classes

    itemsize = jnp.dtype(inputs.dtype).itemsize
    sub = _sublane_multiple(itemsize)
    if block_b is None:
        block_b = _pick_block_b(B, C, itemsize)
    assert block_b % 8 == 0, "block_b must be a multiple of 8 sublanes"

    num_blocks = pl.cdiv(B, block_b)

    x = inputs                                    # native dtype: no HBM copy/upcast
    t = targets.astype(jnp.int32).reshape(B, 1)   # tiny

    kernel = _make_kernel(num_classes, epsilon, B, block_b)

    cost = pl.CostEstimate(
        flops=10 * B * C,
        transcendentals=B * C,
        bytes_accessed=B * C * itemsize + B * 4 + num_blocks * 8 * 128 * 4,
    )

    partials = pl.pallas_call(
        kernel,
        out_shape=jax.ShapeDtypeStruct((num_blocks, 8, 128), jnp.float32),
        grid=(num_blocks,),
        in_specs=[
            pl.BlockSpec((block_b, C), lambda i: (i, 0)),
            pl.BlockSpec((block_b, 1), lambda i: (i, 0)),
        ],
        out_specs=pl.BlockSpec((1, 8, 128), lambda i: (i, 0, 0)),
        compiler_params=pltpu.CompilerParams(
            dimension_semantics=("parallel",),
            vmem_limit_bytes=48 * 1024 * 1024,
        ),
        cost_estimate=cost,
    )(x, t)

    # loss = (-smooth * log_probs).mean(0).sum() == total_row_loss_sum / B.
    return jnp.sum(partials[:, 0, 0]) / B


def _reference(inputs, targets, num_classes, epsilon=0.1):
    log_probs = jax.nn.log_softmax(inputs.astype(jnp.float32), axis=1)
    onehot = jax.nn.one_hot(targets, num_classes, dtype=jnp.float32)
    smooth = (1.0 - epsilon) * onehot + epsilon / num_classes
    return jnp.sum(jnp.mean(-smooth * log_probs, axis=0))


if __name__ == "__main__":
    key = jax.random.PRNGKey(0)

    # Small shapes consistent with the module: batch=8, num_classes=32.
    B, C = 8, 32
    k1, k2, k3, k4 = jax.random.split(key, 4)
    logits = jax.random.normal(k1, (B, C), dtype=jnp.float32)
    labels = jax.random.randint(k2, (B,), 0, C, dtype=jnp.int32)

    loss = cross_entropy_label_smooth(logits, labels, num_classes=C, epsilon=0.1)
    loss = jax.block_until_ready(loss)
    ref = _reference(logits, labels, C, 0.1)
    assert jnp.allclose(loss, ref, rtol=1e-5, atol=1e-5), (loss, ref)

    # Ragged batch with an explicit small block: exercises the partial final
    # block (no wrapper-side padding of logits) and in-kernel row masking.
    B2, C2 = 20, 32
    logits2 = jax.random.normal(k3, (B2, C2), dtype=jnp.float32)
    labels2 = jax.random.randint(k4, (B2,), 0, C2, dtype=jnp.int32)
    loss2 = cross_entropy_label_smooth(logits2, labels2, num_classes=C2,
                                       epsilon=0.1, block_b=8)
    loss2 = jax.block_until_ready(loss2)
    ref2 = _reference(logits2, labels2, C2, 0.1)
    assert jnp.allclose(loss2, ref2, rtol=1e-5, atol=1e-5), (loss2, ref2)

    # bf16 logits: exercises the native-dtype label gather, the 16-row sublane
    # multiple, the auto-picked multi-block grid and the partial final block.
    logits3 = logits2.astype(jnp.bfloat16)
    loss3 = cross_entropy_label_smooth(logits3, labels2, num_classes=C2,
                                       epsilon=0.1)
    loss3 = jax.block_until_ready(loss3)
    ref3 = _reference(logits3, labels2, C2, 0.1)
    assert jnp.allclose(loss3, ref3, rtol=1e-5, atol=1e-5), (loss3, ref3)

    print("KERNEL_OK")
</pallas_src>

<mosaic_0001>
module attributes {stable_mosaic.version = 11 : i64} {
  func.func @kernel(%arg0: i32, %arg1: memref<8x32xf32, #tpu.memory_space<vmem>>, %arg2: memref<8x1xi32, #tpu.memory_space<vmem>>, %arg3: memref<1x8x128xf32, #tpu.memory_space<vmem>>) attributes {dimension_semantics = [#tpu.dimension_semantics<parallel>], iteration_bounds = array<i64: 1>, scalar_prefetch = 0 : i64, scratch_operands = 0 : i64, tpu.core_type = #tpu.core_type<tc>, window_params = [{transform_indices = @transform_0, window_bounds = array<i64: 8, 32>}, {transform_indices = @transform_1, window_bounds = array<i64: 8, 1>}, {transform_indices = @transform_2, window_bounds = array<i64: 1, 8, 128>}]} {
    %c0 = arith.constant 0 : index
    %c0_0 = arith.constant 0 : index
    %0 = vector.load %arg1[%c0, %c0_0] : memref<8x32xf32, #tpu.memory_space<vmem>>, vector<8x32xf32>
    %c0_1 = arith.constant 0 : index
    %c0_2 = arith.constant 0 : index
    %1 = vector.load %arg2[%c0_1, %c0_2] : memref<8x1xi32, #tpu.memory_space<vmem>>, vector<8x1xi32>
    %cst = arith.constant dense<0xFF800000> : vector<8xf32>
    %2 = vector.multi_reduction <maximumf>, %0, %cst [1] : vector<8x32xf32> to vector<8xf32>
    %3 = vector.shape_cast %2 : vector<8xf32> to vector<8x1xf32>
    %4 = vector.broadcast %3 : vector<8x1xf32> to vector<8x32xf32>
    %5 = arith.subf %0, %4 : vector<8x32xf32>
    %6 = math.exp %5 : vector<8x32xf32>
    %cst_3 = arith.constant dense<0.000000e+00> : vector<8xf32>
    %7 = vector.multi_reduction <add>, %6, %cst_3 [1] : vector<8x32xf32> to vector<8xf32>
    %8 = vector.shape_cast %7 : vector<8xf32> to vector<8x1xf32>
    %9 = math.log %8 : vector<8x1xf32>
    %10 = arith.addf %3, %9 : vector<8x1xf32>
    %11 = tpu.iota {dimensions = array<i32: 1>} : vector<8x32xi32>
    %12 = vector.broadcast %1 : vector<8x1xi32> to vector<8x32xi32>
    %13 = arith.cmpi eq, %11, %12 : vector<8x32xi32>
    %cst_4 = arith.constant 0.000000e+00 : f32
    %14 = vector.broadcast %cst_4 : f32 to vector<8x32xf32>
    %15 = arith.select %13, %0, %14 : vector<8x32xi1>, vector<8x32xf32>
    %cst_5 = arith.constant dense<0.000000e+00> : vector<8xf32>
    %16 = vector.multi_reduction <add>, %15, %cst_5 [1] : vector<8x32xf32> to vector<8xf32>
    %17 = vector.shape_cast %16 : vector<8xf32> to vector<8x1xf32>
    %cst_6 = arith.constant dense<0.000000e+00> : vector<8xf32>
    %18 = vector.multi_reduction <add>, %0, %cst_6 [1] : vector<8x32xf32> to vector<8xf32>
    %19 = vector.shape_cast %18 : vector<8xf32> to vector<8x1xf32>
    %cst_7 = arith.constant 0.899999976 : f32
    %20 = vector.broadcast %cst_7 : f32 to vector<8x1xf32>
    %21 = arith.mulf %20, %17 : vector<8x1xf32>
    %22 = arith.subf %10, %21 : vector<8x1xf32>
    %cst_8 = arith.constant 3.125000e-03 : f32
    %23 = vector.broadcast %cst_8 : f32 to vector<8x1xf32>
    %24 = arith.mulf %23, %19 : vector<8x1xf32>
    %25 = arith.subf %22, %24 : vector<8x1xf32>
    %c8_i32 = arith.constant 8 : i32
    %26 = arith.muli %arg0, %c8_i32 : i32
    %27 = tpu.iota {dimensions = array<i32: 0>} : vector<8x1xi32>
    %28 = vector.broadcast %26 : i32 to vector<8x1xi32>
    %29 = arith.addi %28, %27 : vector<8x1xi32>
    %c8_i32_9 = arith.constant 8 : i32
    %30 = vector.broadcast %c8_i32_9 : i32 to vector<8x1xi32>
    %31 = arith.cmpi slt, %29, %30 : vector<8x1xi32>
    %cst_10 = arith.constant 0.000000e+00 : f32
    %32 = vector.broadcast %cst_10 : f32 to vector<8x1xf32>
    %33 = arith.select %31, %25, %32 : vector<8x1xi1>, vector<8x1xf32>
    %34 = vector.shape_cast %33 : vector<8x1xf32> to vector<1x8x1xf32>
    %cst_11 = arith.constant dense<0.000000e+00> : vector<1xf32>
    %35 = vector.multi_reduction <add>, %34, %cst_11 [1, 2] : vector<1x8x1xf32> to vector<1xf32>
    %36 = vector.shape_cast %35 : vector<1xf32> to vector<1x1x1xf32>
    %37 = vector.extract %36[0, 0, 0] : f32 from vector<1x1x1xf32>
    %38 = vector.broadcast %37 : f32 to vector<1x8x128xf32>
    %c0_12 = arith.constant 0 : index
    %c0_13 = arith.constant 0 : index
    %c0_14 = arith.constant 0 : index
    %39 = vector.load %arg3[%c0_12, %c0_13, %c0_14] : memref<1x8x128xf32, #tpu.memory_space<vmem>>, vector<1x8x128xf32>
    tpu.vector_store %arg3[%c0_12, %c0_13, %c0_14], %38 {strides = array<i32>} : memref<1x8x128xf32, #tpu.memory_space<vmem>>, vector<1x8x128xf32>,
    return
  }
  func.func @transform_0(%arg0: i32) -> (i32, i32) {
    %c0_i32 = arith.constant 0 : i32
    %c0_i32_0 = arith.constant 0 : i32
    return %arg0, %c0_i32 : i32, i32
  }
  func.func @transform_1(%arg0: i32) -> (i32, i32) {
    %c0_i32 = arith.constant 0 : i32
    %c0_i32_0 = arith.constant 0 : i32
    return %arg0, %c0_i32 : i32, i32
  }
  func.func @transform_2(%arg0: i32) -> (i32, i32, i32) {
    %c0_i32 = arith.constant 0 : i32
    %c0_i32_0 = arith.constant 0 : i32
    %c0_i32_1 = arith.constant 0 : i32
    return %arg0, %c0_i32, %c0_i32_0 : i32, i32, i32
  }
}

</mosaic_0001>

<bundles_post_ra>
// kernel: tpu_custom_call.1
= control target key start
LH: loop header
LB: loop body
LE: loop exit
PB: predicated region body
PF: predicated region fallthrough
CT: control target
= control target key end

     0   :  { %vm14_vm0 = vcmask 261120   ;;  %s150_s0 = inlined_call_operand.vmem [shape: f32[8,32], index: 0, kind: input, shape index: {}]   ;;  %s151_s1 = inlined_call_operand.vmem [shape: s32[8,1], index: 1, kind: input, shape index: {}]   ;;  %s152_s2 = inlined_call_operand.hbm [shape: f32[1,8,128], index: 2, kind: output, shape index: {}]  }
   0x1   :  { %v12_v0 = vld [vmem:[%s150_s0] sm:$0xff] }
   0x2   :  { %7 = vsyncpa [#allocation3], 0  ;;  %v15_v1 = vsel %vm14_vm0, %v12_v0, -inf  ;;  %v111_v2 = vmov 0   ;;  %v13_v3 = vld [vmem:[%s151_s1] sm:$0xff]  ;;  %v27_v7 = vlaneseq  ;;  %v37_v14 = vsel %vm14_vm0, %v12_v0, 0.0 }
   0x3   :  { %82 = vset.pattern.permute.xlu0 %v111_v2  ;;  %vm51_vm2 = vcmask 7168   ;;  %s112_s0 = smov [#allocation2]  }
   0x4   :  { %16 = vmax.xlane.f32.xlu0 %v15_v1  ;;  %v28_v8 = vand.u32 127, %v27_v7  ;;  %s70_s1 = sshll.u32 %s112_s0, 4  ;;  %s71_s1 = int_to_ptr.vmem [resolvable:$true] %s70_s1 }
   0x5   :  { %s87_s14 = scalar_lea.vmem %s71_s1, 128  ;;  %p92_p1 = scmp.lt.s32.totalorder %s71_s1, %s71_s1 }
   0x6   :  { %p88_p0 = scmp.ne.s32.totalorder %s71_s1, %s87_s14  ;;  %p93_p2 = scmp.lt.s32.totalorder %s87_s14, %s87_s14 }
   0x8   :  { %p94_p3 = por %p93_p2, %p92_p1 }
   0xa   :  { %p95_p4 = pnand %p94_p3, %p88_p0 }
  0x1a   :  { %30 = vperm.xlu0 %82, %v13_v3  }
  0x91   :  { %v17_v4 = vpop.xlane.xlu0 %16 }
  0x92   :  { %v18_v5 = vsub.f32 %v12_v0, %v17_v4 }
  0x94   :  { %v19_v6 = vmul.f32 1.442695, %v18_v5 }
  0x96   :  { %83 = vpow2.f32 %v19_v6 }
  0x99   :  { %v31_v9 = vpop.permute.xlu0 %30 }
  0x9a   :  { %vm32_vm1 = vcmp.eq.s32.totalorder %v28_v8, %v31_v9 }
  0x9b   :  { %v33_v11 = vsel %vm32_vm1, %v12_v0, 0.0 }
  0x9c   :  { %v34_v13 = vsel %vm14_vm0, %v33_v11, 0.0 }
  0xa0   :  { %v84_v10 = vpop.eup %83 }
  0xa1   :  { %v21_v12 = vsel %vm14_vm0, %v84_v10, 0.0 }
  0xa2   :  { %22 = vadd.xlane.f32.xlu1 %v21_v12 }
  0xa6   :  { %35 = vadd.xlane.f32.xlu1 %v34_v13 }
  0xaa   :  { %38 = vadd.xlane.f32.xlu1 %v37_v14 }
 0x12f   :  { %v23_v15 = vpop.xlane.xlu1 %22 }
 0x130   :  { %85 = vlog2.f32 %v23_v15 }
 0x133   :  { %v36_v16 = vpop.xlane.xlu1 %35 }
 0x134   :  { %v40_v21 = vmul.f32 0.9, %v36_v16 }
 0x137   :  { %v39_v18 = vpop.xlane.xlu1 %38 }
 0x138   :  { %v42_v22 = vmul.f32 0.003125, %v39_v18 }
 0x13a   :  { %v86_v17 = vpop.eup %85 }
 0x13b   :  { %v25_v19 = vmul.f32 0.6931472, %v86_v17 }
 0x13d   :  { %v26_v20 = vadd.f32 %v25_v19, %v17_v4 }
 0x13f   :  { %v41_v23 = vsub.f32 %v26_v20, %v40_v21 }
 0x141   :  { %v43_v24 = vsub.f32 %v41_v23, %v42_v22 }
 0x143   :  { %v52_v25 = vsel %vm51_vm2, %v43_v24, 0.0 }
 0x144   :  { %53 = vadd.xlane.f32.xlu1 %v52_v25 }
 0x1d1   :  { %v54_v26 = vpop.xlane.xlu1 %53 }
 0x1d2   :  { %v55_v27 = vrot.slane %v54_v26, 4 }
 0x1d4   :  { %v56_v28 = vadd.f32 %v55_v27, %v54_v26 }
 0x1d6   :  { %v57_v29 = vrot.slane %v56_v28, 2 }
 0x1d8   :  { %v58_v30 = vadd.f32 %v57_v29, %v56_v28 }
 0x1da   :  { %v59_v31 = vrot.slane %v58_v30, 1 }
 0x1dc   :  { %v60_v32 = vadd.f32 %v59_v31, %v58_v30 }
 0x1de   :  { %78 = vpush %v60_v32 }
 0x20f   :  { %s79_s13 = spop %78 }
 0x210   :  { %v62_v33 = vstv %s79_s13 }
 0x211   :  { %63 = vst [vmem:[#allocation2] sm:$0xff] %v62_v33 }
 0x212   :  { %98 = shalt.err (!%p95_p4)
}
 0x213   :  { %s99_s17 = scalar_lea.hbm %s152_s2, 128 }
 0x214   :  { %p100_p5 = scmp.ne.s32.totalorder %s152_s2, %s99_s17  ;;  %p103_p6 = scmp.lt.u32.totalorder %s99_s17, %s152_s2 }
 0x216   :  { %p105_p7 = pnand %p103_p6, %p100_p5 }
 0x218   :  { %108 = shalt.err (!%p105_p7)
}
 0x219   :  { %73 = dma.vmem_to_hbm [thread:$0]  %s71_s1, 128, %s152_s2, [#allocation3]  }
 0x21a   :  { %109 = dma.done.wait [#allocation3], 128  }
 0x21b   :  { %110 = vsyncadd [#allocation3], 4294967168 }
 0x21c   :  { %77 = vsyncpa [#allocation3], 1 }

</bundles_post_ra>
